<compile_context>
chip_gen: v5e
topology: v5e:2x2
jax: 0.10.0
libtpu: 0.0.40
codegen_flags: <defaults>
</compile_context>

<pallas_src>
import functools

import jax
import jax.numpy as jnp
import numpy as np
from jax.experimental import pallas as pl
from jax.experimental.pallas import tpu as pltpu


def _fc_sml1_kernel(x_ref, t_ref, out_ref, *, n_valid, r_tile, needs_mask):
    """x_ref: (3, r_tile, 128) logits; t_ref: (r_tile, 128) class ids (native dtype);
    out_ref: (8, 128) f32 per-tile partial sum of (ce + smooth_l1/3)."""
    i = pl.program_id(1)
    n_i = pl.num_programs(1)

    def smooth_l1(diff):
        d = jnp.abs(diff)
        return jnp.where(d < 1.0, 0.5 * d * d, d - 0.5)

    def tile_sum(masked):
        # per-class lane-dense slabs; upcast to f32 inside the kernel (inputs may be bf16)
        x0 = x_ref[0].astype(jnp.float32)
        x1 = x_ref[1].astype(jnp.float32)
        x2 = x_ref[2].astype(jnp.float32)
        t = t_ref[...]

        # one-hot of the target class, built with plain VPU compares (works for float or
        # int targets; values outside {0,1,2} give all-zero rows like Multi_targets does)
        oh0 = (t == 0).astype(jnp.float32)
        oh1 = (t == 1).astype(jnp.float32)
        oh2 = (t == 2).astype(jnp.float32)

        # cross entropy: logsumexp(logits) - logit[target], unrolled over the 3 classes
        m = jnp.maximum(jnp.maximum(x0, x1), x2)
        se = jnp.exp(x0 - m) + jnp.exp(x1 - m) + jnp.exp(x2 - m)
        logit_t = x0 * oh0 + x1 * oh1 + x2 * oh2
        ce = jnp.log(se) + m - logit_t

        # smooth L1 (beta = 1.0) between logits and one-hot targets, summed over classes
        sl1 = smooth_l1(x0 - oh0) + smooth_l1(x1 - oh1) + smooth_l1(x2 - oh2)

        # fused per-pixel contribution: loss = sum(val) / (B*N)
        val = ce + sl1 * (1.0 / 3.0)

        if masked:
            # mask zero-padded tail / out-of-bounds rows of the last tile. jnp.where is a
            # select, so non-finite garbage in masked slots cannot leak into the sum.
            r = jax.lax.broadcasted_iota(jnp.int32, (r_tile, 128), 0)
            l = jax.lax.broadcasted_iota(jnp.int32, (r_tile, 128), 1)
            idx = (i * r_tile + r) * 128 + l
            val = jnp.where(idx < n_valid, val, 0.0)

        # (r_tile, 128) -> (8, 128): groups of 8 rows map exactly onto vregs, so this is a
        # layout-free reshape followed by pure elementwise vreg adds (no cross-lane traffic).
        out_ref[...] = jnp.sum(val.reshape(r_tile // 8, 8, 128), axis=0)

    if needs_mask:
        @pl.when(i < n_i - 1)
        def _():
            tile_sum(masked=False)

        @pl.when(i == n_i - 1)
        def _():
            tile_sum(masked=True)
    else:
        tile_sum(masked=False)


def fc_sml1_loss(inputs, targets, *, max_rows_per_tile=1024):
    """inputs: [B, 3, D, H, W] float logits; targets: [B, 1, D, H, W] (values in {0,1,2})."""
    B, C = int(inputs.shape[0]), int(inputs.shape[1])
    assert C == 3, "FC_SML1_loss is defined for 3 classes"
    n = int(np.prod(inputs.shape[2:]))

    # free (metadata-only) reshapes to the flattened spatial layout -- no transpose, no cast
    x = inputs.reshape(B, C, n)
    t = jnp.squeeze(targets, axis=1).reshape(B, n)

    # pad the flattened spatial dim up to a multiple of 8*128 so it maps onto full
    # (rows, 128) lane-dense slabs (copy only when actually needed).
    n_pad = pl.cdiv(n, 1024) * 1024
    if n_pad != n:
        x = jnp.pad(x, ((0, 0), (0, 0), (0, n_pad - n)))
        t = jnp.pad(t, ((0, 0), (0, n_pad - n)))
    rows = n_pad // 128

    x = x.reshape(B, C, rows, 128)     # native dtype (f32 or bf16)
    t = t.reshape(B, rows, 128)        # native dtype -- no extra cast pass over the targets

    r_tile = min(rows, max_rows_per_tile)          # both are multiples of 8
    n_tiles = pl.cdiv(rows, r_tile)
    # masking is needed only if the last tile contains padded or out-of-bounds pixels
    needs_mask = (n != n_tiles * r_tile * 128)

    kernel = functools.partial(
        _fc_sml1_kernel, n_valid=n, r_tile=r_tile, needs_mask=needs_mask
    )
    partials = pl.pallas_call(
        kernel,
        out_shape=jax.ShapeDtypeStruct((B, n_tiles, 8, 128), jnp.float32),
        grid=(B, n_tiles),
        in_specs=[
            pl.BlockSpec((None, C, r_tile, 128), lambda b, i: (b, 0, i, 0)),
            pl.BlockSpec((None, r_tile, 128), lambda b, i: (b, i, 0)),
        ],
        out_specs=pl.BlockSpec((None, None, 8, 128), lambda b, i: (b, i, 0, 0)),
        compiler_params=pltpu.CompilerParams(
            # every (b, i) writes its own independent partial -> both axes parallel
            dimension_semantics=("parallel", "parallel"),
        ),
    )(x, t)

    # tiny final scalar reduction in XLA:
    #   CE mean over B*N pixels + SmoothL1 mean over B*N*C elements == sum(partials)/(B*N)
    return jnp.sum(partials) / (B * n)


def _reference_loss(inputs, targets):
    t = jnp.squeeze(targets, axis=1).astype(jnp.int32)
    logp = jax.nn.log_softmax(inputs.astype(jnp.float32), axis=1)
    onehot = jax.nn.one_hot(t, 3, axis=1, dtype=jnp.float32)
    ce = -jnp.mean(jnp.sum(logp * onehot, axis=1))
    d = jnp.abs(inputs.astype(jnp.float32) - onehot)
    sl1 = jnp.mean(jnp.where(d < 1.0, 0.5 * d * d, d - 0.5))
    return ce + sl1


if __name__ == "__main__":
    key = jax.random.PRNGKey(0)

    # case 1: spatial size divisible by 1024 -> no pad copy, no masking compiled at all
    k1, k2, k3, k4 = jax.random.split(key, 4)
    B, C, D, H, W = 2, 3, 16, 16, 16
    inputs = jax.random.normal(k1, (B, C, D, H, W), dtype=jnp.float32)
    targets = jax.random.randint(k2, (B, 1, D, H, W), 0, 3).astype(jnp.float32)
    loss = jax.block_until_ready(fc_sml1_loss(inputs, targets))
    ref = _reference_loss(inputs, targets)
    np.testing.assert_allclose(np.asarray(loss), np.asarray(ref), rtol=1e-5, atol=1e-5)

    # case 2: ragged spatial size -> exercises the pad + last-tile masking path
    B2, D2, H2, W2 = 2, 10, 12, 14
    inputs2 = jax.random.normal(k3, (B2, C, D2, H2, W2), dtype=jnp.float32)
    targets2 = jax.random.randint(k4, (B2, 1, D2, H2, W2), 0, 3).astype(jnp.float32)
    loss2 = jax.block_until_ready(fc_sml1_loss(inputs2, targets2))
    ref2 = _reference_loss(inputs2, targets2)
    np.testing.assert_allclose(np.asarray(loss2), np.asarray(ref2), rtol=1e-5, atol=1e-5)

    print("KERNEL_OK")
</pallas_src>

<mosaic_0001>
module attributes {stable_mosaic.version = 11 : i64} {
  func.func @_fc_sml1_kernel(%arg0: i32, %arg1: i32, %arg2: memref<1x3x32x128xf32, #tpu.memory_space<vmem>>, %arg3: memref<1x32x128xf32, #tpu.memory_space<vmem>>, %arg4: memref<1x1x8x128xf32, #tpu.memory_space<vmem>>) attributes {dimension_semantics = [#tpu.dimension_semantics<parallel>, #tpu.dimension_semantics<parallel>], iteration_bounds = array<i64: 2, 1>, scalar_prefetch = 0 : i64, scratch_operands = 0 : i64, tpu.core_type = #tpu.core_type<tc>, window_params = [{transform_indices = @transform_0, window_bounds = array<i64: 1, 3, 32, 128>}, {transform_indices = @transform_1, window_bounds = array<i64: 1, 32, 128>}, {transform_indices = @transform_2, window_bounds = array<i64: 1, 1, 8, 128>}]} {
    %c0 = arith.constant 0 : index
    %c0_0 = arith.constant 0 : index
    %c0_1 = arith.constant 0 : index
    %c0_2 = arith.constant 0 : index
    %0 = vector.load %arg2[%c0, %c0_0, %c0_1, %c0_2] : memref<1x3x32x128xf32, #tpu.memory_space<vmem>>, vector<1x1x32x128xf32>
    %1 = vector.shape_cast %0 : vector<1x1x32x128xf32> to vector<32x128xf32>
    %c0_3 = arith.constant 0 : index
    %c1 = arith.constant 1 : index
    %c0_4 = arith.constant 0 : index
    %c0_5 = arith.constant 0 : index
    %2 = vector.load %arg2[%c0_3, %c1, %c0_4, %c0_5] : memref<1x3x32x128xf32, #tpu.memory_space<vmem>>, vector<1x1x32x128xf32>
    %3 = vector.shape_cast %2 : vector<1x1x32x128xf32> to vector<32x128xf32>
    %c0_6 = arith.constant 0 : index
    %c2 = arith.constant 2 : index
    %c0_7 = arith.constant 0 : index
    %c0_8 = arith.constant 0 : index
    %4 = vector.load %arg2[%c0_6, %c2, %c0_7, %c0_8] : memref<1x3x32x128xf32, #tpu.memory_space<vmem>>, vector<1x1x32x128xf32>
    %5 = vector.shape_cast %4 : vector<1x1x32x128xf32> to vector<32x128xf32>
    %c0_9 = arith.constant 0 : index
    %c0_10 = arith.constant 0 : index
    %c0_11 = arith.constant 0 : index
    %6 = vector.load %arg3[%c0_9, %c0_10, %c0_11] : memref<1x32x128xf32, #tpu.memory_space<vmem>>, vector<1x32x128xf32>
    %7 = vector.shape_cast %6 : vector<1x32x128xf32> to vector<32x128xf32>
    %cst = arith.constant 0.000000e+00 : f32
    %8 = vector.broadcast %cst : f32 to vector<32x128xf32>
    %9 = arith.cmpf oeq, %7, %8 : vector<32x128xf32>
    %10 = arith.extui %9 : vector<32x128xi1> to vector<32x128xi32>
    %11 = arith.sitofp %10 : vector<32x128xi32> to vector<32x128xf32>
    %cst_12 = arith.constant 1.000000e+00 : f32
    %12 = vector.broadcast %cst_12 : f32 to vector<32x128xf32>
    %13 = arith.cmpf oeq, %7, %12 : vector<32x128xf32>
    %14 = arith.extui %13 : vector<32x128xi1> to vector<32x128xi32>
    %15 = arith.sitofp %14 : vector<32x128xi32> to vector<32x128xf32>
    %cst_13 = arith.constant 2.000000e+00 : f32
    %16 = vector.broadcast %cst_13 : f32 to vector<32x128xf32>
    %17 = arith.cmpf oeq, %7, %16 : vector<32x128xf32>
    %18 = arith.extui %17 : vector<32x128xi1> to vector<32x128xi32>
    %19 = arith.sitofp %18 : vector<32x128xi32> to vector<32x128xf32>
    %20 = arith.maximumf %1, %3 : vector<32x128xf32>
    %21 = arith.maximumf %20, %5 : vector<32x128xf32>
    %22 = arith.subf %1, %21 : vector<32x128xf32>
    %23 = math.exp %22 : vector<32x128xf32>
    %24 = arith.subf %3, %21 : vector<32x128xf32>
    %25 = math.exp %24 : vector<32x128xf32>
    %26 = arith.addf %23, %25 : vector<32x128xf32>
    %27 = arith.subf %5, %21 : vector<32x128xf32>
    %28 = math.exp %27 : vector<32x128xf32>
    %29 = arith.addf %26, %28 : vector<32x128xf32>
    %30 = arith.mulf %1, %11 : vector<32x128xf32>
    %31 = arith.mulf %3, %15 : vector<32x128xf32>
    %32 = arith.addf %30, %31 : vector<32x128xf32>
    %33 = arith.mulf %5, %19 : vector<32x128xf32>
    %34 = arith.addf %32, %33 : vector<32x128xf32>
    %35 = math.log %29 : vector<32x128xf32>
    %36 = arith.addf %35, %21 : vector<32x128xf32>
    %37 = arith.subf %36, %34 : vector<32x128xf32>
    %38 = arith.subf %1, %11 : vector<32x128xf32>
    %39 = math.absf %38 : vector<32x128xf32>
    %cst_14 = arith.constant 1.000000e+00 : f32
    %40 = vector.broadcast %cst_14 : f32 to vector<32x128xf32>
    %41 = arith.cmpf olt, %39, %40 : vector<32x128xf32>
    %cst_15 = arith.constant 5.000000e-01 : f32
    %42 = vector.broadcast %cst_15 : f32 to vector<32x128xf32>
    %43 = arith.mulf %42, %39 : vector<32x128xf32>
    %44 = arith.mulf %43, %39 : vector<32x128xf32>
    %cst_16 = arith.constant 5.000000e-01 : f32
    %45 = vector.broadcast %cst_16 : f32 to vector<32x128xf32>
    %46 = arith.subf %39, %45 : vector<32x128xf32>
    %47 = arith.select %41, %44, %46 : vector<32x128xi1>, vector<32x128xf32>
    %48 = arith.subf %3, %15 : vector<32x128xf32>
    %49 = math.absf %48 : vector<32x128xf32>
    %cst_17 = arith.constant 1.000000e+00 : f32
    %50 = vector.broadcast %cst_17 : f32 to vector<32x128xf32>
    %51 = arith.cmpf olt, %49, %50 : vector<32x128xf32>
    %cst_18 = arith.constant 5.000000e-01 : f32
    %52 = vector.broadcast %cst_18 : f32 to vector<32x128xf32>
    %53 = arith.mulf %52, %49 : vector<32x128xf32>
    %54 = arith.mulf %53, %49 : vector<32x128xf32>
    %cst_19 = arith.constant 5.000000e-01 : f32
    %55 = vector.broadcast %cst_19 : f32 to vector<32x128xf32>
    %56 = arith.subf %49, %55 : vector<32x128xf32>
    %57 = arith.select %51, %54, %56 : vector<32x128xi1>, vector<32x128xf32>
    %58 = arith.addf %47, %57 : vector<32x128xf32>
    %59 = arith.subf %5, %19 : vector<32x128xf32>
    %60 = math.absf %59 : vector<32x128xf32>
    %cst_20 = arith.constant 1.000000e+00 : f32
    %61 = vector.broadcast %cst_20 : f32 to vector<32x128xf32>
    %62 = arith.cmpf olt, %60, %61 : vector<32x128xf32>
    %cst_21 = arith.constant 5.000000e-01 : f32
    %63 = vector.broadcast %cst_21 : f32 to vector<32x128xf32>
    %64 = arith.mulf %63, %60 : vector<32x128xf32>
    %65 = arith.mulf %64, %60 : vector<32x128xf32>
    %cst_22 = arith.constant 5.000000e-01 : f32
    %66 = vector.broadcast %cst_22 : f32 to vector<32x128xf32>
    %67 = arith.subf %60, %66 : vector<32x128xf32>
    %68 = arith.select %62, %65, %67 : vector<32x128xi1>, vector<32x128xf32>
    %69 = arith.addf %58, %68 : vector<32x128xf32>
    %cst_23 = arith.constant 0.333333343 : f32
    %70 = vector.broadcast %cst_23 : f32 to vector<32x128xf32>
    %71 = arith.mulf %69, %70 : vector<32x128xf32>
    %72 = arith.addf %37, %71 : vector<32x128xf32>
    %73 = vector.shape_cast %72 : vector<32x128xf32> to vector<4x8x128xf32>
    %cst_24 = arith.constant dense<0.000000e+00> : vector<8x128xf32>
    %74 = vector.multi_reduction <add>, %73, %cst_24 [0] : vector<4x8x128xf32> to vector<8x128xf32>
    %c0_25 = arith.constant 0 : index
    %c0_26 = arith.constant 0 : index
    %c0_27 = arith.constant 0 : index
    %c0_28 = arith.constant 0 : index
    %75 = vector.load %arg4[%c0_25, %c0_26, %c0_27, %c0_28] : memref<1x1x8x128xf32, #tpu.memory_space<vmem>>, vector<1x1x8x128xf32>
    %76 = vector.shape_cast %75 : vector<1x1x8x128xf32> to vector<8x128xf32>
    %77 = vector.shape_cast %74 : vector<8x128xf32> to vector<1x1x8x128xf32>
    tpu.vector_store %arg4[%c0_25, %c0_26, %c0_27, %c0_28], %77 {strides = array<i32>} : memref<1x1x8x128xf32, #tpu.memory_space<vmem>>, vector<1x1x8x128xf32>,
    return
  }
  func.func @transform_0(%arg0: i32, %arg1: i32) -> (i32, i32, i32, i32) {
    %c0_i32 = arith.constant 0 : i32
    %c0_i32_0 = arith.constant 0 : i32
    %c0_i32_1 = arith.constant 0 : i32
    return %arg0, %c0_i32, %arg1, %c0_i32_0 : i32, i32, i32, i32
  }
  func.func @transform_1(%arg0: i32, %arg1: i32) -> (i32, i32, i32) {
    %c0_i32 = arith.constant 0 : i32
    %c0_i32_0 = arith.constant 0 : i32
    return %arg0, %arg1, %c0_i32 : i32, i32, i32
  }
  func.func @transform_2(%arg0: i32, %arg1: i32) -> (i32, i32, i32, i32) {
    %c0_i32 = arith.constant 0 : i32
    %c0_i32_0 = arith.constant 0 : i32
    %c0_i32_1 = arith.constant 0 : i32
    return %arg0, %arg1, %c0_i32, %c0_i32_0 : i32, i32, i32, i32
  }
}

</mosaic_0001>

<bundles_post_ra>
// kernel: tpu_custom_call.1
= control target key start
LH: loop header
LB: loop body
LE: loop exit
PB: predicated region body
PF: predicated region fallthrough
CT: control target
= control target key end

     0   :  { %7 = vsyncpa [#allocation3], 0  ;;  %s1274_s0 = inlined_call_operand.hbm [shape: f32[2,3,32,128], index: 0, kind: input, shape index: {}]   ;;  %s1275_s1 = inlined_call_operand.hbm [shape: f32[2,32,128], index: 1, kind: input, shape index: {}]   ;;  %s1276_s2 = inlined_call_operand.hbm [shape: f32[2,1,8,128], index: 2, kind: output, shape index: {}]  }
   0x1   :  { %9 = vsyncpa [#allocation3 + $0x1], 0 }
   0x2   :  { %10 = vsyncpa [#allocation6], 0 }
   0x3   :  { %12 = vsyncpa [#allocation6 + $0x1], 0 }
   0x4   :  { %13 = vsyncpa [#allocation4], 0 }
   0x5   :  { %15 = vsyncpa [#allocation4 + $0x1], 0  ;;  %s920_s9 = smov 0   ;;  %s922_s10 = smov 0  }
   0x6   :  { %s924_s11 = smov 0   ;;  %s926_s12 = smov 0  }
   0x7   :  { %s928_s13 = smov 0   ;;  %s930_s14 = smov 0  }
   0x8 LB: > { %s601_s15 = sadd.s32 4294967295, %s900_s14   ;;  %s602_s16 = sadd.s32 4294967294, %s900_s14   ;;  %s900_s14 = sphi %s930_s14, %s21_s14   ;;  %s896_s13 = sphi %s928_s13, %s1286_s13   ;;  %s892_s12 = sphi %s926_s12, %s1285_s12   ;;  %s888_s11 = sphi %s924_s11, %s1284_s11   ;;  %s884_s10 = sphi %s922_s10, %s1283_s10   ;;  %s880_s9 = sphi %s920_s9, %s1282_s9  }
   0x9   : > { %s33_s17 = sadd.s32 1, %s896_s13  ;;  %s42_s18 = sadd.s32 1, %s888_s11 }
   0xa   : > { %p35_p0 = scmp.ge.s32.totalorder %s33_s17, 2  ;;  %p49_p1 = scmp.ne.s32.totalorder %s888_s11, %s884_s10 }
   0xb   : > { %p50_p2 = scmp.eq.s32.totalorder %s900_s14, 0  ;;  %p55_p3 = scmp.ne.s32.totalorder %s884_s10, %s880_s9 }
   0xc   : > { %s1288_s17 = smov (%p35_p0, %s33_s17), 0  ;;  %p56_p5 = scmp.eq.s32.totalorder %s601_s15, 0 }
   0xd   : > { %p961_p4 = por %p50_p2, %p49_p1  ;;  %s37_s20 = ssub.s32 %s896_s13, %s1288_s17 }
   0xe   : > { %p109_p6 = scmp.eq.s32.totalorder %s601_s15, 1  ;;  %p40_p7 = scmp.eq.s32.totalorder %s37_s20, 0 }
   0xf   : > { %p967_p8 = por %p56_p5, %p55_p3  ;;  %p115_p10 = scmp.eq.s32.totalorder %s602_s16, 1 }
  0x10   : > { %p971_p9 = por %p109_p6, %p49_p1  ;;  %p604_p12 = scmp.ge.s32.totalorder %s900_s14, 2 }
  0x11   : > { %s976_s23 = scalar_select %p40_p7, %s888_s11, %s42_s18  }
  0x12   : > { %p978_p11 = por %p115_p10, %p55_p3  ;;  %p669_p13 = scmp.lt.s32.totalorder %s900_s14, 2 }
  0x13   : > { %s985_s25 = sand.u32 1, %s888_s11   ;;  %s650_s27 = smul.u32 96, %s896_s13 }
  0x14   : > { %s649_s26 = smul.u32 96, %s985_s25  ;;  %p991_p0 = pnand %p669_p13, %p961_p4 }
  0x15   : > { %s146_s3 = scalar_lea.hbm %s1274_s0, %s650_s27  ;;  %p609_p1 = scmp.ge.s32.totalorder %s900_s14, 1 }
  0x16   : > { %s139_s4 = scalar_lea.vmem [#allocation2], %s649_s26  ;;  %s147_s6 = sshll.u32 %s146_s3, 4  ;;  %s148_s6 = int_to_ptr.hbm [resolvable:$true] %s147_s6 }
  0x17   : > { %s149_s5 = sshll.u32 %s139_s4, 4  ;;  %s136_s7 = scalar_lea.sflag [#allocation3], %s985_s25  ;;  %s150_s5 = int_to_ptr.vmem [resolvable:$true] %s149_s5 }
  0x18   : > { %s902_s8 = smov 128   ;;  %s903_s15 = smov 8  }
  0x19   : > { %661 = dma.hbm_to_vmem [thread:$0]  (!%p991_p0), %s148_s6, 1536, %s150_s5, %s136_s7, %s902_s8, %s902_s8, %s903_s15  }
  0x1a   : > { %p181_p2 = scmp.lt.s32.totalorder %s900_s14, 3  ;;  %s606_s16 = sshll.u32 %s985_s25, 5 }
  0x1b   : > { %s648_s18 = sshll.u32 %s896_s13, 5  ;;  %s163_s27 = scalar_lea.vmem [#allocation5], %s606_s16 }
  0x1c   : > { %p182_p3 = pnand %p609_p1, %p181_p2  ;;  %s170_s26 = scalar_lea.hbm %s1275_s1, %s648_s18 }
  0x1d   : > { %s173_s29 = sshll.u32 %s163_s27, 4  ;;  %s171_s30 = sshll.u32 %s170_s26, 4  ;;  %s174_s29 = int_to_ptr.vmem [resolvable:$true] %s173_s29  ;;  %s172_s30 = int_to_ptr.hbm [resolvable:$true] %s171_s30 }
  0x1e   : > { %s160_s3 = scalar_lea.sflag [#allocation6], %s985_s25  ;;  %185 = sbr.rel (%p182_p3) target bundleno = 108 (0x6c), region = 28 }
  0x1f   : > { %664 = dma.hbm_to_vmem [thread:$0]  (!%p991_p0), %s172_s30, 512, %s174_s29, %s160_s3, %s902_s8, %s902_s8, %s903_s15  }
  0x20   : > { %s1012_s4 = sand.u32 (!%p182_p3), 1, %s884_s10  }
  0x21   : > { %s651_s5 = smul.u32 (!%p182_p3), 96, %s1012_s4  ;;  %s188_s6 = scalar_lea.sflag (!%p182_p3), [#allocation3], %s1012_s4 }
  0x23   : > { %s1016_s7 = scalar_lea.vmem [#allocation2], %s651_s5 }
  0x24   : > { %867 = dma.done.wait (%p967_p8), %s188_s6, 1536  }
  0x25   : > { %869 = vsyncadd (%p967_p8), %s188_s6, 4294965760  ;;  %s610_s25 = sshll.u32 %s1012_s4, 5  ;;  %s198_s28 = scalar_lea.sflag [#allocation6], %s1012_s4 }
  0x26   : > { %s201_s8 = scalar_lea.vmem [#allocation5], %s610_s25 }
  0x27   : > { %871 = dma.done.wait (%p967_p8), %s198_s28, 512  }
  0x28   : > { %873 = vsyncadd (%p967_p8), %s198_s28, 4294966784  ;;  %v1029_v0 = vld [vmem:[%s1016_s7] sm:$0xff]  ;;  %v1032_v1 = vld [vmem:[%s1016_s7 + $0x8] sm:$0xff]  ;;  %v904_v22 = vmov 0.0   ;;  %s611_s21 = sshll.u32 %s1012_s4, 3  ;;  %s645_s15 = sshll.u32 %s892_s12, 3 }
  0x29   : > { %v1035_v2 = vld [vmem:[%s1016_s7 + $0x20] sm:$0xff]  ;;  %v1038_v3 = vld [vmem:[%s1016_s7 + $0x28] sm:$0xff]  ;;  %v1041_v4 = vld [vmem:[%s1016_s7 + $0x10] sm:$0xff]  ;;  %s488_s19 = scalar_lea.hbm %s1276_s2, %s645_s15  ;;  %s227_s20 = scalar_lea.vmem [#allocation7], %s611_s21 }
  0x2a   : > { %v1044_v5 = vld [vmem:[%s1016_s7 + $0x18] sm:$0xff]  ;;  %v1047_v6 = vld [vmem:[%s1016_s7 + $0x30] sm:$0xff]  ;;  %v284_v7 = vmax.f32 %v1029_v0, %v1035_v2  ;;  %v1055_v9 = vld [vmem:[%s1016_s7 + $0x40] sm:$0xff]  ;;  %v285_v11 = vmax.f32 %v1032_v1, %v1038_v3  ;;  %s490_s26 = sshll.u32 %s227_s20, 4  ;;  %s492_s27 = sshll.u32 %s488_s19, 4  ;;  %s491_s26 = int_to_ptr.vmem [resolvable:$true] %s490_s26  ;;  %s493_s27 = int_to_ptr.hbm [resolvable:$true] %s492_s27 }
  0x2b   : > { %v1052_v8 = vld [vmem:[%s1016_s7 + $0x38] sm:$0xff]  ;;  %v1058_v10 = vld [vmem:[%s1016_s7 + $0x48] sm:$0xff]  ;;  %v244_v12 = vld [vmem:[%s201_s8] sm:$0xff]  ;;  %v286_v16 = vmax.f32 %v1041_v4, %v1047_v6  ;;  %s477_s12 = scalar_lea.sflag [#allocation4], %s1012_s4  ;;  %s828_s29 = sshra.s32 %s493_s27, 4  ;;  %s829_s29 = int_to_ptr.hbm [resolvable:$true] %s828_s29 }
  0x2c   : > { %v245_v13 = vld [vmem:[%s201_s8 + $0x8] sm:$0xff]  ;;  %v1062_v14 = vld [vmem:[%s201_s8 + $0x10] sm:$0xff]  ;;  %v1064_v15 = vld [vmem:[%s201_s8 + $0x18] sm:$0xff]  ;;  %vm248_vm0 = vcmp.eq.f32.partialorder %v244_v12, 0.0  ;;  %vm260_vm4 = vcmp.eq.f32.partialorder %v244_v12, 1.0  ;;  %v287_v17 = vmax.f32 %v1044_v5, %v1052_v8  ;;  %v1073_v18 = vmax.f32 %v284_v7, %v1055_v9  ;;  %s830_s30 = scalar_lea.hbm %s829_s29, 8  ;;  %p835_p7 = scmp.lt.s32.totalorder %s829_s29, %s1276_s2 }
  0x2d   : > { %vm249_vm1 = vcmp.eq.f32.partialorder %v245_v13, 0.0  ;;  %vm250_vm2 = vcmp.eq.f32.partialorder %v1062_v14, 0.0  ;;  %vm251_vm3 = vcmp.eq.f32.partialorder %v1064_v15, 0.0  ;;  %vm261_vm5 = vcmp.eq.f32.partialorder %v245_v13, 1.0  ;;  %v1081_v20 = vld [vmem:[%s1016_s7 + $0x50] sm:$0xff]  ;;  %v1084_v21 = vld [vmem:[%s1016_s7 + $0x58] sm:$0xff]  ;;  %p831_p4 = scmp.ne.s32.totalorder %s829_s29, %s830_s30 }
  0x2e   : > { %vm262_vm6 = vcmp.eq.f32.partialorder %v1062_v14, 1.0  ;;  %vm263_vm7 = vcmp.eq.f32.partialorder %v1064_v15, 1.0  ;;  %v1078_v19 = vmax.f32 %v285_v11, %v1058_v10  ;;  %v1086_v23 = vsel %vm248_vm0, 1.0, %v904_v22  ;;  %s834_s6 = scalar_lea.hbm %s1276_s2, 16 }
  0x2f   : > { %v1088_v24 = vsel %vm249_vm1, 1.0, %v904_v22  ;;  %v1090_v25 = vsel %vm250_vm2, 1.0, %v904_v22  ;;  %v1092_v26 = vsel %vm251_vm3, 1.0, %v904_v22  ;;  %v1094_v27 = vsel %vm260_vm4, 1.0, %v904_v22  ;;  %p832_p5 = pnand %p831_p4, %p971_p9  ;;  %p836_p8 = scmp.lt.s32.totalorder %s834_s6, %s830_s30 }
  0x30   : > { %v1096_v28 = vsel %vm261_vm5, 1.0, %v904_v22  ;;  %v1098_v29 = vsel %vm262_vm6, 1.0, %v904_v22  ;;  %vm272_vm8 = vcmp.eq.f32.partialorder %v244_v12, 2.0  ;;  %v1100_v30 = vsel %vm263_vm7, 1.0, %v904_v22 }
  0x31   : > { %vm273_vm9 = vcmp.eq.f32.partialorder %v245_v13, 2.0  ;;  %vm274_vm10 = vcmp.eq.f32.partialorder %v1062_v14, 2.0  ;;  %vm275_vm11 = vcmp.eq.f32.partialorder %v1064_v15, 2.0  ;;  %v1105_v31 = vmax.f32 %v286_v16, %v1081_v20  ;;  %p833_p6 = pneg %p832_p5  ;;  %p837_p10 = por %p836_p8, %p835_p7 }
  0x32   : > { %v1108_v32 = vmax.f32 %v287_v17, %v1084_v21  ;;  %v292_v33 = vsub.f32 %v1029_v0, %v1073_v18  ;;  %v293_v34 = vsub.f32 %v1032_v1, %v1078_v19  ;;  %v1114_v35 = vsel %vm272_vm8, 1.0, %v904_v22 }
  0x33   : > { %v304_v36 = vsub.f32 %v1035_v2, %v1073_v18  ;;  %v305_v37 = vsub.f32 %v1038_v3, %v1078_v19  ;;  %v320_v38 = vsub.f32 %v1055_v9, %v1073_v18  ;;  %v294_v39 = vsub.f32 %v1041_v4, %v1105_v31  ;;  %p838_p13 = pnand %p837_p10, %p833_p6 }
  0x34   : > { %v295_v40 = vsub.f32 %v1044_v5, %v1108_v32  ;;  %v296_v41 = vmul.f32 1.442695, %v292_v33  ;;  %v298_v42 = vmul.f32 1.442695, %v293_v34  ;;  %v1126_v43 = vsel %vm273_vm9, 1.0, %v904_v22 }
  0x35   : > { %v306_v44 = vsub.f32 %v1047_v6, %v1105_v31  ;;  %v307_v45 = vsub.f32 %v1052_v8, %v1108_v32  ;;  %v321_v46 = vsub.f32 %v1058_v10, %v1078_v19  ;;  %v300_v47 = vmul.f32 1.442695, %v294_v39 }
  0x36   : > { %722 = vpow2.f32 %v296_v41  ;;  %v302_v48 = vmul.f32 1.442695, %v295_v40  ;;  %v308_v49 = vmul.f32 1.442695, %v304_v36  ;;  %v310_v50 = vmul.f32 1.442695, %v305_v37 }
  0x37   : > { %724 = vpow2.f32 %v298_v42  ;;  %v312_v51 = vmul.f32 1.442695, %v306_v44  ;;  %v322_v52 = vsub.f32 %v1081_v20, %v1105_v31  ;;  %v314_v53 = vmul.f32 1.442695, %v307_v45 }
  0x38   : > { %726 = vpow2.f32 %v300_v47  ;;  %v323_v54 = vsub.f32 %v1084_v21, %v1108_v32  ;;  %v324_v55 = vmul.f32 1.442695, %v320_v38  ;;  %v326_v56 = vmul.f32 1.442695, %v321_v46 }
  0x39   : > { %728 = vpow2.f32 %v302_v48  ;;  %v336_v57 = vmul.f32 %v1086_v23, %v1029_v0  ;;  %v337_v58 = vmul.f32 %v1088_v24, %v1032_v1  ;;  %v338_v59 = vmul.f32 %v1090_v25, %v1041_v4 }
  0x3a   : > { %730 = vpow2.f32 %v308_v49  ;;  %v339_v60 = vmul.f32 %v1092_v26, %v1044_v5  ;;  %v340_v61 = vmul.f32 %v1094_v27, %v1035_v2  ;;  %v341_v62 = vmul.f32 %v1096_v28, %v1038_v3 }
  0x3b   : > { %732 = vpow2.f32 %v310_v50  ;;  %v342_v63 = vmul.f32 %v1098_v29, %v1047_v6  ;;  %v343_v7 = vmul.f32 %v1100_v30, %v1052_v8  ;;  %v1156_v12 = vsel %vm274_vm10, 1.0, %v904_v22 }
  0x3c   : > { %v723_v11 = vpop.eup %722  ;;  %v1160_v13 = vsel %vm275_vm11, 1.0, %v904_v22  ;;  %734 = vpow2.f32 %v312_v51  ;;  %v328_v16 = vmul.f32 1.442695, %v322_v52  ;;  %v330_v33 = vmul.f32 1.442695, %v323_v54 }
  0x3d   : > { %v725_v17 = vpop.eup %724  ;;  %736 = vpow2.f32 %v314_v53  ;;  %v344_v34 = vadd.f32 %v340_v61, %v336_v57  ;;  %v348_v36 = vmul.f32 %v1114_v35, %v1055_v9  ;;  %v345_v38 = vadd.f32 %v341_v62, %v337_v58 }
  0x3e   : > { %v727_v37 = vpop.eup %726  ;;  %738 = vpow2.f32 %v324_v55  ;;  %v346_v39 = vadd.f32 %v342_v63, %v338_v59  ;;  %v349_v14 = vmul.f32 %v1126_v43, %v1058_v10  ;;  %v347_v15 = vadd.f32 %v343_v7, %v339_v60 }
  0x3f   : > { %v729_v40 = vpop.eup %728  ;;  %740 = vpow2.f32 %v326_v56  ;;  %v372_v22 = vsub.f32 %v1029_v0, %v1086_v23  ;;  %v373_v41 = vsub.f32 %v1032_v1, %v1088_v24  ;;  %v350_v44 = vmul.f32 %v1156_v12, %v1081_v20 }
  0x40   : > { %v731_v42 = vpop.eup %730  ;;  %742 = vpow2.f32 %v328_v16  ;;  %v351_v45 = vmul.f32 %v1160_v13, %v1084_v21  ;;  %v374_v46 = vsub.f32 %v1041_v4, %v1090_v25  ;;  %v375_v0 = vsub.f32 %v1044_v5, %v1092_v26 }
  0x41   : > { %v733_v47 = vpop.eup %732  ;;  %v316_v48 = vadd.f32 %v731_v42, %v723_v11  ;;  %744 = vpow2.f32 %v330_v33  ;;  %v376_v23 = vand.u32 2147483647, %v372_v22  ;;  %v377_v24 = vand.u32 2147483647, %v373_v41 }
  0x42   : > { %v735_v49 = vpop.eup %734  ;;  %v317_v1 = vadd.f32 %v733_v47, %v725_v17  ;;  %v1178_v52 = vand.u32 2147483647, %v374_v46  ;;  %v1180_v55 = vadd.f32 %v348_v36, %v344_v34  ;;  %v1182_v56 = vadd.f32 %v349_v14, %v345_v38 }
  0x43   : > { %v737_v50 = vpop.eup %736  ;;  %v318_v51 = vadd.f32 %v735_v49, %v727_v37  ;;  %v1184_v4 = vand.u32 2147483647, %v375_v0  ;;  %v1186_v58 = vadd.f32 %v350_v44, %v346_v39  ;;  %v1188_v5 = vadd.f32 %v351_v45, %v347_v15 }
  0x44   : > { %v739_v53 = vpop.eup %738  ;;  %v319_v54 = vadd.f32 %v737_v50, %v729_v40  ;;  %v384_v26 = vmul.f32 0.5, %v376_v23  ;;  %vm380_vm12 = vcmp.lt.f32.partialorder %v376_v23, 1.0  ;;  %v385_v61 = vmul.f32 0.5, %v377_v24 }
  0x45   : > { %v741_v25 = vpop.eup %740  ;;  %v332_v57 = vadd.f32 %v739_v53, %v316_v48  ;;  %v400_v62 = vsub.f32 %v1035_v2, %v1094_v27  ;;  %vm381_vm13 = vcmp.lt.f32.partialorder %v377_v24, 1.0  ;;  %v386_v11 = vmul.f32 0.5, %v1178_v52 }
  0x46   : > { %v743_v59 = vpop.eup %742  ;;  %v333_v60 = vadd.f32 %v741_v25, %v317_v1  ;;  %vm382_vm14 = vcmp.lt.f32.partialorder %v1178_v52, 1.0  ;;  %v387_v17 = vmul.f32 0.5, %v1184_v4  ;;  %v388_v33 = vmul.f32 %v384_v26, %v376_v23 }
  0x47   : > { %v745_v63 = vpop.eup %744  ;;  %v334_v7 = vadd.f32 %v743_v59, %v318_v51  ;;  %746 = vlog2.f32 %v332_v57  ;;  %v632_v34 = vadd.f32 -0.5, %v376_v23  ;;  %v401_v36 = vsub.f32 %v1038_v3, %v1096_v28 }
  0x48   : > { %v335_v16 = vadd.f32 %v745_v63, %v319_v54  ;;  %748 = vlog2.f32 %v333_v60  ;;  %vm383_vm15 = vcmp.lt.f32.partialorder %v1184_v4, 1.0  ;;  %v389_v2 = vmul.f32 %v385_v61, %v377_v24 }
  0x49   : > { %750 = vlog2.f32 %v334_v7  ;;  %v633_v27 = vadd.f32 -0.5, %v377_v24  ;;  %v402_v37 = vsub.f32 %v1047_v6, %v1098_v29  ;;  %v390_v38 = vmul.f32 %v386_v11, %v1178_v52 }
  0x4a   : > { %v403_v39 = vsub.f32 %v1052_v8, %v1100_v30  ;;  %v404_v14 = vand.u32 2147483647, %v400_v62  ;;  %v405_v40 = vand.u32 2147483647, %v401_v36  ;;  %752 = vlog2.f32 %v335_v16 }
  0x4b   : > { %v391_v15 = vmul.f32 %v387_v17, %v1184_v4  ;;  %v634_v22 = vadd.f32 -0.5, %v1178_v52  ;;  %v406_v3 = vand.u32 2147483647, %v402_v37  ;;  %v635_v41 = vadd.f32 -0.5, %v1184_v4 }
  0x4c   : > { %v396_v42 = vsel %vm380_vm12, %v388_v33, %v632_v34  ;;  %v407_v44 = vand.u32 2147483647, %v403_v39  ;;  %v412_v6 = vmul.f32 0.5, %v404_v14  ;;  %v397_v45 = vsel %vm381_vm13, %v389_v2, %v633_v27 }
  0x4d   : > { %v747_v28 = vpop.eup %746  ;;  %v413_v46 = vmul.f32 0.5, %v405_v40  ;;  %v414_v8 = vmul.f32 0.5, %v406_v3  ;;  %v432_v30 = vsub.f32 %v1055_v9, %v1114_v35  ;;  %vm408_vm0 = vcmp.lt.f32.partialorder %v404_v14, 1.0 }
  0x4e   : > { %v749_v29 = vpop.eup %748  ;;  %vm409_vm1 = vcmp.lt.f32.partialorder %v405_v40, 1.0  ;;  %v415_v48 = vmul.f32 0.5, %v407_v44  ;;  %v416_v0 = vmul.f32 %v412_v6, %v404_v14  ;;  %v357_v49 = vmul.f32 0.6931472, %v747_v28 }
  0x4f   : > { %v751_v47 = vpop.eup %750  ;;  %vm410_vm2 = vcmp.lt.f32.partialorder %v406_v3, 1.0  ;;  %v417_v1 = vmul.f32 %v413_v46, %v405_v40  ;;  %v418_v23 = vmul.f32 %v414_v8, %v406_v3  ;;  %v359_v50 = vmul.f32 0.6931472, %v749_v29 }
  0x50   : > { %v361_v51 = vmul.f32 0.6931472, %v751_v47  ;;  %v419_v53 = vmul.f32 %v415_v48, %v407_v44  ;;  %v636_v54 = vadd.f32 -0.5, %v404_v14  ;;  %v753_v24 = vpop.eup %752  ;;  %vm411_vm3 = vcmp.lt.f32.partialorder %v407_v44, 1.0 }
  0x51   : > { %v637_v25 = vadd.f32 -0.5, %v405_v40  ;;  %v638_v57 = vadd.f32 -0.5, %v406_v3  ;;  %v433_v9 = vsub.f32 %v1058_v10, %v1126_v43  ;;  %v398_v35 = vsel %vm382_vm14, %v390_v38, %v634_v22 }
  0x52   : > { %v639_v26 = vadd.f32 -0.5, %v407_v44  ;;  %v424_v59 = vsel %vm408_vm0, %v416_v0, %v636_v54  ;;  %v434_v60 = vsub.f32 %v1081_v20, %v1156_v12  ;;  %v364_v61 = vadd.f32 %v357_v49, %v1073_v18 }
  0x53   : > { %v399_v62 = vsel %vm383_vm15, %v391_v15, %v635_v41  ;;  %v425_v63 = vsel %vm409_vm1, %v417_v1, %v637_v25  ;;  %v426_v7 = vsel %vm410_vm2, %v418_v23, %v638_v57  ;;  %v363_v11 = vmul.f32 0.6931472, %v753_v24 }
  0x54   : > { %v365_v10 = vadd.f32 %v359_v50, %v1078_v19  ;;  %v366_v43 = vadd.f32 %v361_v51, %v1105_v31  ;;  %v427_v52 = vsel %vm411_vm3, %v419_v53, %v639_v26  ;;  %v428_v16 = vadd.f32 %v424_v59, %v396_v42 }
  0x55   : > { %v435_v17 = vsub.f32 %v1084_v21, %v1160_v13  ;;  %v436_v20 = vand.u32 2147483647, %v432_v30  ;;  %v437_v12 = vand.u32 2147483647, %v433_v9  ;;  %v429_v18 = vadd.f32 %v425_v63, %v397_v45 }
  0x56   : > { %v430_v33 = vadd.f32 %v426_v7, %v398_v35  ;;  %v431_v4 = vadd.f32 %v427_v52, %v399_v62  ;;  %v438_v34 = vand.u32 2147483647, %v434_v60  ;;  %v367_v15 = vadd.f32 %v363_v11, %v1108_v32 }
  0x57   : > { %v439_v36 = vand.u32 2147483647, %v435_v17  ;;  %vm440_vm4 = vcmp.lt.f32.partialorder %v436_v20, 1.0  ;;  %vm441_vm5 = vcmp.lt.f32.partialorder %v437_v12, 1.0  ;;  %v444_v2 = vmul.f32 0.5, %v436_v20 }
  0x58   : > { %vm442_vm6 = vcmp.lt.f32.partialorder %v438_v34, 1.0  ;;  %v445_v27 = vmul.f32 0.5, %v437_v12  ;;  %v446_v19 = vmul.f32 0.5, %v438_v34  ;;  %v640_v37 = vadd.f32 -0.5, %v436_v20 }
  0x59   : > { %vm443_vm7 = vcmp.lt.f32.partialorder %v439_v36, 1.0  ;;  %v447_v31 = vmul.f32 0.5, %v439_v36  ;;  %v448_v38 = vmul.f32 %v444_v2, %v436_v20  ;;  %v641_v39 = vadd.f32 -0.5, %v437_v12 }
  0x5a   : > { %v449_v14 = vmul.f32 %v445_v27, %v437_v12  ;;  %v450_v21 = vmul.f32 %v446_v19, %v438_v34  ;;  %v642_v13 = vadd.f32 -0.5, %v438_v34  ;;  %v643_v40 = vadd.f32 -0.5, %v439_v36 }
  0x5b   : > { %v368_v22 = vsub.f32 %v364_v61, %v1180_v55  ;;  %v451_v3 = vmul.f32 %v447_v31, %v439_v36  ;;  %v456_v28 = vsel %vm440_vm4, %v448_v38, %v640_v37  ;;  %v369_v41 = vsub.f32 %v365_v10, %v1182_v56 }
  0x5c   : > { %v457_v42 = vsel %vm441_vm5, %v449_v14, %v641_v39  ;;  %v458_v44 = vsel %vm442_vm6, %v450_v21, %v642_v13  ;;  %v460_v6 = vadd.f32 %v456_v28, %v428_v16  ;;  %v370_v29 = vsub.f32 %v366_v43, %v1186_v58 }
  0x5d   : > { %v459_v45 = vsel %vm443_vm7, %v451_v3, %v643_v40  ;;  %v461_v46 = vadd.f32 %v457_v42, %v429_v18  ;;  %v462_v8 = vadd.f32 %v458_v44, %v430_v33  ;;  %v371_v55 = vsub.f32 %v367_v15, %v1188_v5 }
  0x5e   : > { %v463_v32 = vadd.f32 %v459_v45, %v431_v4  ;;  %v464_v30 = vmul.f32 0.33333334, %v460_v6 }
  0x5f   : > { %v465_v47 = vmul.f32 0.33333334, %v461_v46  ;;  %v466_v48 = vmul.f32 0.33333334, %v462_v8 }
  0x60   : > { %v467_v56 = vmul.f32 0.33333334, %v463_v32  ;;  %v468_v0 = vadd.f32 %v464_v30, %v368_v22 }
  0x61   : > { %v469_v49 = vadd.f32 %v465_v47, %v369_v41  ;;  %v470_v1 = vadd.f32 %v466_v48, %v370_v29 }
  0x62   : > { %v471_v58 = vadd.f32 %v467_v56, %v371_v55 }
  0x63   : > { %v472_v23 = vadd.f32 %v469_v49, %v468_v0 }
  0x65   : > { %v473_v50 = vadd.f32 %v472_v23, %v470_v1 }
  0x67   : > { %v474_v51 = vadd.f32 %v473_v50, %v471_v58 }
  0x69   : > { %475 = vst [vmem:[%s227_s20] sm:$0xff] %v474_v51 }
  0x6a   : > { %841 = shalt.err (!%p838_p13)
}
  0x6b   : > { %656 = dma.vmem_to_hbm [thread:$0]  (%p971_p9), %s491_s26, 128, %s493_s27, %s477_s12  }
  0x6c PF: > { %s504_s4 = sand.u32 1, %s880_s9   ;;  %p666_p0 = pnand %p604_p12, %p978_p11 }
  0x6d   : > { %s505_s28 = scalar_lea.sflag [#allocation4], %s504_s4 }
  0x6e   : > { %p667_p1 = pneg %p666_p0 }
  0x70   : > { %875 = dma.done.wait (%p667_p1), %s505_s28, 128  }
  0x71   : > { %877 = vsyncadd (%p667_p1), %s505_s28, 4294967168  ;;  %s21_s14 = sadd.s32 1, %s900_s14   ;;  %s1282_s9 = smov %s884_s10 }
  0x72   : > { %p18_p2 = scmp.ge.s32.totalorder %s21_s14, 4   ;;  %s1283_s10 = smov %s888_s11 }
  0x73   : > { %s1284_s11 = smov %s976_s23  ;;  %s1285_s12 = smov %s896_s13 }
  0x74   : > { %s1286_s13 = smov %s1288_s17  ;;  %20 = sbr.rel (!%p18_p2) target bundleno = 8 (0x8), region = 88 }
  0x79   :  { %511 = vsyncpa [#allocation3], 1 }
  0x7a   :  { %513 = vsyncpa [#allocation3 + $0x1], 1 }
  0x7b   :  { %514 = vsyncpa [#allocation6], 1 }
  0x7c   :  { %516 = vsyncpa [#allocation6 + $0x1], 1 }
  0x7d   :  { %517 = vsyncpa [#allocation4], 1 }
  0x7e   :  { %519 = vsyncpa [#allocation4 + $0x1], 1 }

</bundles_post_ra>
